<compile_context>
chip_gen: v7x
topology: tpu7x:2x2x1
jax: 0.10.0
libtpu: 0.0.40
codegen_flags: <defaults>
</compile_context>

<pallas_src>
import functools

import jax
import jax.numpy as jnp
from jax.experimental import pallas as pl
from jax.experimental.pallas import tpu as pltpu


def _round_up(x, m):
    return ((x + m - 1) // m) * m


# ----------------------------- activation helpers -----------------------------

def _elu(x):
    # ELU(alpha=1): x if x > 0 else exp(x) - 1  (clamp exp arg for padded junk)
    return jnp.where(x > 0, x, jnp.exp(jnp.minimum(x, 0.0)) - 1.0)


def _softplus(x):
    # numerically-stable log(1 + exp(x)); matches torch.nn.Softplus(beta=1)
    return jnp.maximum(x, 0.0) + jnp.log(1.0 + jnp.exp(-jnp.abs(x)))


def _sigmoid(x):
    # exact reciprocal (bin probabilities may feed a log-likelihood); flip to
    # approx=True if ~1e-3 error is acceptable downstream.
    return pl.reciprocal(1.0 + jnp.exp(-x))


# ---------------------------------- kernel ------------------------------------

def p_x_z_kernel(n_hidden, pad_bin, pad_con,
                 z_ref, w_in_ref, w_h_ref, b_all_ref, w_head_ref, b_head_ref,
                 out_ref):
    # input layer + ELU: (dim_h, dim_in) @ (dim_in, TB) -> (dim_h, TB)
    z = jnp.dot(w_in_ref[...], z_ref[...], preferred_element_type=jnp.float32)
    z = _elu(z + b_all_ref[0])                       # bias stays 2-D (dim_h, 1)

    # (nh - 1) hidden layers + ELU  (static trip count -> unrolled; static
    # Python-int indexing of the stacked weights/biases, no dynamic slices)
    for i in range(n_hidden):
        h = jnp.dot(w_h_ref[i], z, preferred_element_type=jnp.float32)
        z = _elu(h + b_all_ref[i + 1])

    # Fused head: one matmul with rows = [bin(->24) | mu(->8) | sigma(->8)].
    head = jnp.dot(w_head_ref[...], z, preferred_element_type=jnp.float32)
    head = head + b_head_ref[...]

    # Per-section activations on sublane-tile-aligned static row ranges:
    # sigmoid only on the bin rows, softplus only on the sigma rows.
    s0, s1 = pad_bin, pad_bin + pad_con
    s2 = pad_bin + 2 * pad_con
    out_ref[0:s0, :] = _sigmoid(head[0:s0, :])
    out_ref[s0:s1, :] = head[s0:s1, :]
    out_ref[s1:s2, :] = _softplus(head[s1:s2, :])

    # TODO(synk): the PyTorch `if (z != z).all(): raise` NaN check is a
    # data-dependent host-side raise with no clean in-kernel equivalent; omitted.


# --------------------------------- wrapper -------------------------------------

_PALLAS_MIN_BATCH = 64     # below this, pallas_call fixed overhead dominates
_MAX_TILE = 8192           # batch-lane tile cap (multiple of 128; ~1.25 MiB out tile)


@functools.partial(jax.jit,
                   static_argnames=("n_hidden", "dim_out_bin", "dim_out_con"))
def p_x_z_forward_t(z_t, packed, *, n_hidden, dim_out_bin, dim_out_con):
    """Transposed-layout forward: z_t is (dim_in, B); outputs are (d, B).

    Production callers should keep producers/consumers in this (features, batch)
    layout so no XLA transposes are paid around the kernel.
    """
    dim_in, B = z_t.shape
    dim_h = packed["w_in"].shape[0]
    d_pad = packed["w_head"].shape[0]
    pad_bin = _round_up(dim_out_bin, 8)
    pad_con = _round_up(dim_out_con, 8)

    # ---- tiny-batch fallback: plain JAX is cheaper than any pallas_call ----
    if B < _PALLAS_MIN_BATCH:
        z = jax.nn.elu(packed["w_in"] @ z_t + packed["b_all"][0])
        for i in range(n_hidden):
            z = jax.nn.elu(packed["w_h"][i] @ z + packed["b_all"][i + 1])
        head = packed["w_head"] @ z + packed["b_head"]
        x_bin_p = jax.nn.sigmoid(head[:dim_out_bin])
        mu = head[pad_bin:pad_bin + dim_out_con]
        sigma = jax.nn.softplus(
            head[pad_bin + pad_con:pad_bin + pad_con + dim_out_con])
        return x_bin_p, mu, sigma

    # ---- batch-lane tile selection ----
    # Big tiles amortize per-step overhead; for moderate B make >= 2 grid steps
    # so the "parallel" axis can shard across both TensorCores on v7x.
    if B <= 128:
        TB = B
    elif B <= 2 * _MAX_TILE:
        TB = _round_up((B + 1) // 2, 128)
    else:
        TB = _MAX_TILE
    nb = pl.cdiv(B, TB)

    kernel = functools.partial(p_x_z_kernel, n_hidden, pad_bin, pad_con)

    out = pl.pallas_call(
        kernel,
        out_shape=jax.ShapeDtypeStruct((d_pad, B), jnp.float32),
        grid=(nb,),
        in_specs=[
            pl.BlockSpec((dim_in, TB), lambda i: (0, i)),              # z tile (streamed)
            pl.BlockSpec((dim_h, dim_in), lambda i: (0, 0)),           # w_in (resident)
            pl.BlockSpec(packed["w_h"].shape, lambda i: (0, 0, 0)),    # w_h stack
            pl.BlockSpec(packed["b_all"].shape, lambda i: (0, 0, 0)),  # all biases
            pl.BlockSpec((d_pad, dim_h), lambda i: (0, 0)),            # fused head W
            pl.BlockSpec((d_pad, 1), lambda i: (0, 0)),                # fused head b
        ],
        out_specs=pl.BlockSpec((d_pad, TB), lambda i: (0, i)),
        compiler_params=pltpu.CompilerParams(
            dimension_semantics=("parallel",)),
    )(z_t, packed["w_in"], packed["w_h"], packed["b_all"],
      packed["w_head"], packed["b_head"])

    # Split the fused output slab (padding rows are discarded here).
    x_bin_p = out[:dim_out_bin]
    mu = out[pad_bin:pad_bin + dim_out_con]
    sigma = out[pad_bin + pad_con:pad_bin + pad_con + dim_out_con]
    return x_bin_p, mu, sigma


# ----------------------------- params / packing --------------------------------

def init_params(key, dim_in=20, nh=3, dim_h=20, dim_out_bin=19, dim_out_con=6):
    """Deterministic init mimicking torch.nn.Linear default U(-1/sqrt(fan_in), +)."""
    def linear(k, fan_in, fan_out):
        kw, kb = jax.random.split(k)
        bound = 1.0 / jnp.sqrt(float(fan_in))
        w = jax.random.uniform(kw, (fan_in, fan_out), jnp.float32, -bound, bound)
        b = jax.random.uniform(kb, (1, fan_out), jnp.float32, -bound, bound)
        return w, b

    keys = jax.random.split(key, nh + 3)
    w_in, b_in = linear(keys[0], dim_in, dim_h)

    w_hs, b_hs = [], []
    for i in range(nh - 1):
        w, b = linear(keys[1 + i], dim_h, dim_h)
        w_hs.append(w)
        b_hs.append(b[0])
    if nh > 1:
        w_h = jnp.stack(w_hs, axis=0)            # (nh-1, dim_h, dim_h), (in,out)
        b_h = jnp.stack(b_hs, axis=0)            # (nh-1, dim_h)
    else:
        w_h = jnp.zeros((0, dim_h, dim_h), jnp.float32)
        b_h = jnp.zeros((0, dim_h), jnp.float32)

    w_bin, b_bin = linear(keys[nh], dim_h, dim_out_bin)
    w_mu, b_mu = linear(keys[nh + 1], dim_h, dim_out_con)
    w_sig, b_sig = linear(keys[nh + 2], dim_h, dim_out_con)

    return dict(w_in=w_in, b_in=b_in, w_h=w_h, b_h=b_h,
                w_bin=w_bin, b_bin=b_bin, w_mu=w_mu, b_mu=b_mu,
                w_sig=w_sig, b_sig=b_sig)


def pack_params(p, dim_out_bin, dim_out_con):
    """Transpose to (out, in) layout, pad head sections to sublane tiles, and
    fuse the 3 heads / stack the biases -> 6 kernel inputs."""
    dim_h = p["w_in"].shape[1]
    n_hidden = int(p["w_h"].shape[0])

    w_in_t = p["w_in"].T                                    # (dim_h, dim_in)
    if n_hidden > 0:
        w_h_t = jnp.transpose(p["w_h"], (0, 2, 1))          # (nh-1, dim_h, dim_h)
    else:
        # nh == 1: dummy block, never read (hidden loop trip count is 0)
        w_h_t = jnp.zeros((1, dim_h, dim_h), jnp.float32)

    # all layer biases as (nh, dim_h, 1): row 0 = input layer, 1.. = hidden
    b_all = jnp.concatenate([p["b_in"], p["b_h"]], axis=0)[:, :, None]

    pad_bin = _round_up(dim_out_bin, 8)
    pad_con = _round_up(dim_out_con, 8)

    def pad_rows(a, rows):                                   # zero-pad dim 0
        return jnp.pad(a, ((0, rows - a.shape[0]), (0, 0)))

    # fused head rows = [bin (padded) | mu (padded) | sigma (padded)]
    w_head = jnp.concatenate([pad_rows(p["w_bin"].T, pad_bin),
                              pad_rows(p["w_mu"].T, pad_con),
                              pad_rows(p["w_sig"].T, pad_con)], axis=0)
    b_head = jnp.concatenate([pad_rows(p["b_bin"].T, pad_bin),
                              pad_rows(p["b_mu"].T, pad_con),
                              pad_rows(p["b_sig"].T, pad_con)], axis=0)

    packed = dict(w_in=w_in_t, w_h=w_h_t, b_all=b_all,
                  w_head=w_head, b_head=b_head)
    return packed, n_hidden


def reference_forward(z, p):
    """Pure-JAX reference (PyTorch layout: z is (B, dim_in))."""
    h = jax.nn.elu(z @ p["w_in"] + p["b_in"])
    for i in range(p["w_h"].shape[0]):
        h = jax.nn.elu(h @ p["w_h"][i] + p["b_h"][i][None, :])
    x_bin_p = jax.nn.sigmoid(h @ p["w_bin"] + p["b_bin"])
    mu = h @ p["w_mu"] + p["b_mu"]
    sigma = jax.nn.softplus(h @ p["w_sig"] + p["b_sig"])
    return x_bin_p, mu, sigma


# ----------------------------------- main ---------------------------------------

if __name__ == "__main__":
    key = jax.random.PRNGKey(0)
    k_param, k_z = jax.random.split(key)

    DIM_IN, NH, DIM_H, DIM_BIN, DIM_CON = 20, 3, 20, 19, 6
    BATCH = 256   # multiple of 128 -> lane-dense tiles; grid of 2 steps (v7x 2-TC)

    params = init_params(k_param, DIM_IN, NH, DIM_H, DIM_BIN, DIM_CON)
    packed, n_hidden = pack_params(params, DIM_BIN, DIM_CON)
    z_input = jax.random.normal(k_z, (BATCH, DIM_IN), jnp.float32)

    # Kernel runs in the transposed (features, batch) layout; production code
    # should keep its producers/consumers in this layout to avoid transposes.
    z_t = z_input.T
    bin_t, mu_t, sig_t = p_x_z_forward_t(
        z_t, packed,
        n_hidden=n_hidden, dim_out_bin=DIM_BIN, dim_out_con=DIM_CON)
    jax.block_until_ready((bin_t, mu_t, sig_t))

    # sanity check against pure-JAX reference (tolerance covers MXU
    # default-precision f32 matmul differences between Mosaic and XLA)
    ref_bin, ref_mu, ref_sigma = reference_forward(z_input, params)
    TOL = dict(atol=2e-3, rtol=2e-3)
    assert bin_t.shape == (DIM_BIN, BATCH)
    assert mu_t.shape == (DIM_CON, BATCH)
    assert sig_t.shape == (DIM_CON, BATCH)
    assert jnp.allclose(bin_t.T, ref_bin, **TOL)
    assert jnp.allclose(mu_t.T, ref_mu, **TOL)
    assert jnp.allclose(sig_t.T, ref_sigma, **TOL)
    assert bool(jnp.all(sig_t > 0))

    print("KERNEL_OK")
</pallas_src>

<mosaic_0001>
module attributes {stable_mosaic.version = 11 : i64} {
  func.func @p_x_z_kernel(%arg0: i32, %arg1: memref<20x128xf32, #tpu.memory_space<vmem>>, %arg2: memref<20x20xf32, #tpu.memory_space<vmem>>, %arg3: memref<2x20x20xf32, #tpu.memory_space<vmem>>, %arg4: memref<3x20x1xf32, #tpu.memory_space<vmem>>, %arg5: memref<40x20xf32, #tpu.memory_space<vmem>>, %arg6: memref<40x1xf32, #tpu.memory_space<vmem>>, %arg7: memref<40x128xf32, #tpu.memory_space<vmem>>) attributes {dimension_semantics = [#tpu.dimension_semantics<parallel>], iteration_bounds = array<i64: 2>, scalar_prefetch = 0 : i64, scratch_operands = 0 : i64, tpu.core_type = #tpu.core_type<tc>, window_params = [{transform_indices = @transform_0, window_bounds = array<i64: 20, 128>}, {pipeline_mode = #tpu.pipeline_mode<synchronous>, transform_indices = @transform_1, window_bounds = array<i64: 20, 20>}, {pipeline_mode = #tpu.pipeline_mode<synchronous>, transform_indices = @transform_2, window_bounds = array<i64: 2, 20, 20>}, {pipeline_mode = #tpu.pipeline_mode<synchronous>, transform_indices = @transform_3, window_bounds = array<i64: 3, 20, 1>}, {pipeline_mode = #tpu.pipeline_mode<synchronous>, transform_indices = @transform_4, window_bounds = array<i64: 40, 20>}, {pipeline_mode = #tpu.pipeline_mode<synchronous>, transform_indices = @transform_5, window_bounds = array<i64: 40, 1>}, {transform_indices = @transform_6, window_bounds = array<i64: 40, 128>}]} {
    %c0 = arith.constant 0 : index
    %c0_0 = arith.constant 0 : index
    %0 = vector.load %arg2[%c0, %c0_0] : memref<20x20xf32, #tpu.memory_space<vmem>>, vector<20x20xf32>
    %c0_1 = arith.constant 0 : index
    %c0_2 = arith.constant 0 : index
    %1 = vector.load %arg1[%c0_1, %c0_2] : memref<20x128xf32, #tpu.memory_space<vmem>>, vector<20x128xf32>
    %cst = arith.constant dense<0.000000e+00> : vector<20x128xf32>
    %2 = tpu.matmul %0, %1, %cst {dimension_numbers = #tpu.dot_dimension_numbers<[1], [0], [0], [1], [0, 0, 1, 1], [], []>} : vector<20x20xf32>, vector<20x128xf32>, vector<20x128xf32> -> vector<20x128xf32>
    %c0_3 = arith.constant 0 : index
    %c0_4 = arith.constant 0 : index
    %c0_5 = arith.constant 0 : index
    %3 = vector.load %arg4[%c0_3, %c0_4, %c0_5] : memref<3x20x1xf32, #tpu.memory_space<vmem>>, vector<1x20x1xf32>
    %4 = vector.shape_cast %3 : vector<1x20x1xf32> to vector<20x1xf32>
    %5 = vector.broadcast %4 : vector<20x1xf32> to vector<20x128xf32>
    %6 = arith.addf %2, %5 : vector<20x128xf32>
    %cst_6 = arith.constant 0.000000e+00 : f32
    %7 = vector.broadcast %cst_6 : f32 to vector<20x128xf32>
    %8 = arith.cmpf ogt, %6, %7 : vector<20x128xf32>
    %cst_7 = arith.constant 0.000000e+00 : f32
    %9 = vector.broadcast %cst_7 : f32 to vector<20x128xf32>
    %10 = arith.minimumf %6, %9 : vector<20x128xf32>
    %11 = math.exp %10 : vector<20x128xf32>
    %cst_8 = arith.constant 1.000000e+00 : f32
    %12 = vector.broadcast %cst_8 : f32 to vector<20x128xf32>
    %13 = arith.subf %11, %12 : vector<20x128xf32>
    %14 = arith.select %8, %6, %13 : vector<20x128xi1>, vector<20x128xf32>
    %c0_9 = arith.constant 0 : index
    %c0_10 = arith.constant 0 : index
    %c0_11 = arith.constant 0 : index
    %15 = vector.load %arg3[%c0_9, %c0_10, %c0_11] : memref<2x20x20xf32, #tpu.memory_space<vmem>>, vector<1x20x20xf32>
    %16 = vector.shape_cast %15 : vector<1x20x20xf32> to vector<20x20xf32>
    %cst_12 = arith.constant dense<0.000000e+00> : vector<20x128xf32>
    %17 = tpu.matmul %16, %14, %cst_12 {dimension_numbers = #tpu.dot_dimension_numbers<[1], [0], [0], [1], [0, 0, 1, 1], [], []>} : vector<20x20xf32>, vector<20x128xf32>, vector<20x128xf32> -> vector<20x128xf32>
    %c1 = arith.constant 1 : index
    %c0_13 = arith.constant 0 : index
    %c0_14 = arith.constant 0 : index
    %18 = vector.load %arg4[%c1, %c0_13, %c0_14] : memref<3x20x1xf32, #tpu.memory_space<vmem>>, vector<1x20x1xf32>
    %19 = vector.shape_cast %18 : vector<1x20x1xf32> to vector<20x1xf32>
    %20 = vector.broadcast %19 : vector<20x1xf32> to vector<20x128xf32>
    %21 = arith.addf %17, %20 : vector<20x128xf32>
    %cst_15 = arith.constant 0.000000e+00 : f32
    %22 = vector.broadcast %cst_15 : f32 to vector<20x128xf32>
    %23 = arith.cmpf ogt, %21, %22 : vector<20x128xf32>
    %cst_16 = arith.constant 0.000000e+00 : f32
    %24 = vector.broadcast %cst_16 : f32 to vector<20x128xf32>
    %25 = arith.minimumf %21, %24 : vector<20x128xf32>
    %26 = math.exp %25 : vector<20x128xf32>
    %cst_17 = arith.constant 1.000000e+00 : f32
    %27 = vector.broadcast %cst_17 : f32 to vector<20x128xf32>
    %28 = arith.subf %26, %27 : vector<20x128xf32>
    %29 = arith.select %23, %21, %28 : vector<20x128xi1>, vector<20x128xf32>
    %c1_18 = arith.constant 1 : index
    %c0_19 = arith.constant 0 : index
    %c0_20 = arith.constant 0 : index
    %30 = vector.load %arg3[%c1_18, %c0_19, %c0_20] : memref<2x20x20xf32, #tpu.memory_space<vmem>>, vector<1x20x20xf32>
    %31 = vector.shape_cast %30 : vector<1x20x20xf32> to vector<20x20xf32>
    %cst_21 = arith.constant dense<0.000000e+00> : vector<20x128xf32>
    %32 = tpu.matmul %31, %29, %cst_21 {dimension_numbers = #tpu.dot_dimension_numbers<[1], [0], [0], [1], [0, 0, 1, 1], [], []>} : vector<20x20xf32>, vector<20x128xf32>, vector<20x128xf32> -> vector<20x128xf32>
    %c2 = arith.constant 2 : index
    %c0_22 = arith.constant 0 : index
    %c0_23 = arith.constant 0 : index
    %33 = vector.load %arg4[%c2, %c0_22, %c0_23] : memref<3x20x1xf32, #tpu.memory_space<vmem>>, vector<1x20x1xf32>
    %34 = vector.shape_cast %33 : vector<1x20x1xf32> to vector<20x1xf32>
    %35 = vector.broadcast %34 : vector<20x1xf32> to vector<20x128xf32>
    %36 = arith.addf %32, %35 : vector<20x128xf32>
    %cst_24 = arith.constant 0.000000e+00 : f32
    %37 = vector.broadcast %cst_24 : f32 to vector<20x128xf32>
    %38 = arith.cmpf ogt, %36, %37 : vector<20x128xf32>
    %cst_25 = arith.constant 0.000000e+00 : f32
    %39 = vector.broadcast %cst_25 : f32 to vector<20x128xf32>
    %40 = arith.minimumf %36, %39 : vector<20x128xf32>
    %41 = math.exp %40 : vector<20x128xf32>
    %cst_26 = arith.constant 1.000000e+00 : f32
    %42 = vector.broadcast %cst_26 : f32 to vector<20x128xf32>
    %43 = arith.subf %41, %42 : vector<20x128xf32>
    %44 = arith.select %38, %36, %43 : vector<20x128xi1>, vector<20x128xf32>
    %c0_27 = arith.constant 0 : index
    %c0_28 = arith.constant 0 : index
    %45 = vector.load %arg5[%c0_27, %c0_28] : memref<40x20xf32, #tpu.memory_space<vmem>>, vector<40x20xf32>
    %cst_29 = arith.constant dense<0.000000e+00> : vector<40x128xf32>
    %46 = tpu.matmul %45, %44, %cst_29 {dimension_numbers = #tpu.dot_dimension_numbers<[1], [0], [0], [1], [0, 0, 1, 1], [], []>} : vector<40x20xf32>, vector<20x128xf32>, vector<40x128xf32> -> vector<40x128xf32>
    %c0_30 = arith.constant 0 : index
    %c0_31 = arith.constant 0 : index
    %47 = vector.load %arg6[%c0_30, %c0_31] : memref<40x1xf32, #tpu.memory_space<vmem>>, vector<40x1xf32>
    %48 = vector.broadcast %47 : vector<40x1xf32> to vector<40x128xf32>
    %49 = arith.addf %46, %48 : vector<40x128xf32>
    %50 = vector.extract_strided_slice %49 {offsets = [0, 0], sizes = [24, 128], strides = [1, 1]} : vector<40x128xf32> to vector<24x128xf32>
    %cst_32 = arith.constant 0.000000e+00 : f32
    %51 = vector.broadcast %cst_32 : f32 to vector<24x128xf32>
    %52 = arith.subf %51, %50 : vector<24x128xf32>
    %53 = math.exp %52 : vector<24x128xf32>
    %cst_33 = arith.constant 1.000000e+00 : f32
    %54 = vector.broadcast %cst_33 : f32 to vector<24x128xf32>
    %55 = arith.addf %54, %53 : vector<24x128xf32>
    %56 = tpu.reciprocal %55 : vector<24x128xf32> -> vector<24x128xf32>
    %c0_34 = arith.constant 0 : index
    %c0_35 = arith.constant 0 : index
    %57 = vector.load %arg7[%c0_34, %c0_35] : memref<40x128xf32, #tpu.memory_space<vmem>>, vector<24x128xf32>
    tpu.vector_store %arg7[%c0_34, %c0_35], %56 {strides = array<i32>} : memref<40x128xf32, #tpu.memory_space<vmem>>, vector<24x128xf32>,
    %58 = vector.extract_strided_slice %49 {offsets = [24, 0], sizes = [8, 128], strides = [1, 1]} : vector<40x128xf32> to vector<8x128xf32>
    %c24 = arith.constant 24 : index
    %c0_36 = arith.constant 0 : index
    %59 = vector.load %arg7[%c24, %c0_36] : memref<40x128xf32, #tpu.memory_space<vmem>>, vector<8x128xf32>
    tpu.vector_store %arg7[%c24, %c0_36], %58 {strides = array<i32>} : memref<40x128xf32, #tpu.memory_space<vmem>>, vector<8x128xf32>,
    %60 = vector.extract_strided_slice %49 {offsets = [32, 0], sizes = [8, 128], strides = [1, 1]} : vector<40x128xf32> to vector<8x128xf32>
    %cst_37 = arith.constant 0.000000e+00 : f32
    %61 = vector.broadcast %cst_37 : f32 to vector<8x128xf32>
    %62 = arith.maximumf %60, %61 : vector<8x128xf32>
    %63 = math.absf %60 : vector<8x128xf32>
    %cst_38 = arith.constant 0.000000e+00 : f32
    %64 = vector.broadcast %cst_38 : f32 to vector<8x128xf32>
    %65 = arith.subf %64, %63 : vector<8x128xf32>
    %66 = math.exp %65 : vector<8x128xf32>
    %cst_39 = arith.constant 1.000000e+00 : f32
    %67 = vector.broadcast %cst_39 : f32 to vector<8x128xf32>
    %68 = arith.addf %67, %66 : vector<8x128xf32>
    %69 = math.log %68 : vector<8x128xf32>
    %70 = arith.addf %62, %69 : vector<8x128xf32>
    %c32 = arith.constant 32 : index
    %c0_40 = arith.constant 0 : index
    %71 = vector.load %arg7[%c32, %c0_40] : memref<40x128xf32, #tpu.memory_space<vmem>>, vector<8x128xf32>
    tpu.vector_store %arg7[%c32, %c0_40], %70 {strides = array<i32>} : memref<40x128xf32, #tpu.memory_space<vmem>>, vector<8x128xf32>,
    return
  }
  func.func @transform_0(%arg0: i32) -> (i32, i32) {
    %c0_i32 = arith.constant 0 : i32
    %c0_i32_0 = arith.constant 0 : i32
    return %c0_i32, %arg0 : i32, i32
  }
  func.func @transform_1(%arg0: i32) -> (i32, i32) {
    %c0_i32 = arith.constant 0 : i32
    %c0_i32_0 = arith.constant 0 : i32
    %c0_i32_1 = arith.constant 0 : i32
    return %c0_i32, %c0_i32_0 : i32, i32
  }
  func.func @transform_2(%arg0: i32) -> (i32, i32, i32) {
    %c0_i32 = arith.constant 0 : i32
    %c0_i32_0 = arith.constant 0 : i32
    %c0_i32_1 = arith.constant 0 : i32
    %c0_i32_2 = arith.constant 0 : i32
    return %c0_i32, %c0_i32_0, %c0_i32_1 : i32, i32, i32
  }
  func.func @transform_3(%arg0: i32) -> (i32, i32, i32) {
    %c0_i32 = arith.constant 0 : i32
    %c0_i32_0 = arith.constant 0 : i32
    %c0_i32_1 = arith.constant 0 : i32
    %c0_i32_2 = arith.constant 0 : i32
    return %c0_i32, %c0_i32_0, %c0_i32_1 : i32, i32, i32
  }
  func.func @transform_4(%arg0: i32) -> (i32, i32) {
    %c0_i32 = arith.constant 0 : i32
    %c0_i32_0 = arith.constant 0 : i32
    %c0_i32_1 = arith.constant 0 : i32
    return %c0_i32, %c0_i32_0 : i32, i32
  }
  func.func @transform_5(%arg0: i32) -> (i32, i32) {
    %c0_i32 = arith.constant 0 : i32
    %c0_i32_0 = arith.constant 0 : i32
    %c0_i32_1 = arith.constant 0 : i32
    return %c0_i32, %c0_i32_0 : i32, i32
  }
  func.func @transform_6(%arg0: i32) -> (i32, i32) {
    %c0_i32 = arith.constant 0 : i32
    %c0_i32_0 = arith.constant 0 : i32
    return %c0_i32, %arg0 : i32, i32
  }
}

</mosaic_0001>

<bundles_post_ra>
// kernel: p_x_z_forward_t.1
= control target key start
LH: loop header
LB: loop body
LE: loop exit
PB: predicated region body
PF: predicated region fallthrough
CT: control target
= control target key end

     0   :  { %s1257_s21 = smov 0   ;;  %s1259_s22 = smov 0   ;;  %s1474_s0 = inlined_call_operand.vmem [shape: f32[20,256], index: 0, kind: input, shape index: {}]   ;;  %s1475_s1 = inlined_call_operand.vmem [shape: f32[20,20], index: 1, kind: input, shape index: {}]   ;;  %s1476_s2 = inlined_call_operand.vmem [shape: f32[2,20,20], index: 2, kind: input, shape index: {}]   ;;  %s1477_s3 = inlined_call_operand.vmem [shape: f32[3,20,1], index: 3, kind: input, shape index: {}]   ;;  %s1478_s4 = inlined_call_operand.vmem [shape: f32[40,20], index: 4, kind: input, shape index: {}]   ;;  %s1479_s5 = inlined_call_operand.vmem [shape: f32[40,1], index: 5, kind: input, shape index: {}]   ;;  %s1480_s6 = inlined_call_operand.vmem [shape: f32[40,256], index: 6, kind: output, shape index: {}]  }
   0x1   :  { %s1261_s23 = smov 0  }
   0x2 LB: > { %s974_s24 = sadd.s32 4294967295, %s1216_s23   ;;  %s1274_s25 = sadd.s32 1, %s1216_s23   ;;  %s1216_s23 = sphi %s1261_s23, %s1484_s23   ;;  %s1212_s22 = sphi %s1259_s22, %s1483_s22   ;;  %s1208_s21 = sphi %s1257_s21, %s1482_s21  }
   0x3   : > { %s20_s26 = ssub.s32 %s1216_s23, %s1274_s25  ;;  %s23_s27 = sadd.s32 1, %s1212_s22 }
   0x4   : > { %p21_p0 = scmp.eq.s32.totalorder %s20_s26, 0  ;;  %p30_p1 = scmp.ne.s32.totalorder %s1212_s22, %s1208_s21 }
   0x5   : > { %p31_p2 = scmp.eq.s32.totalorder %s1216_s23, 0  ;;  %p165_p3 = scmp.eq.s32.totalorder %s974_s24, 1 }
   0x6   : > { %s1285_s28 = scalar_select %p21_p0, %s1212_s22, %s23_s27  }
   0x7   : > { %p32_p4 = por %p31_p2, %p30_p1  ;;  %p1287_p5 = por %p165_p3, %p30_p1 }
   0x8   : > { %p977_p6 = scmp.ge.s32.totalorder %s1216_s23, 2 }
   0xa   : > { %202 = sbr.rel (%p977_p6) target bundleno = 24 (0x18), region = 36 }
  0x11   : > { %205 = sbr.rel (!%p32_p4) target bundleno = 24 (0x18), region = 40  ;;  %s207_s30 = sand.u32 (%p32_p4), 1, %s1212_s22  }
  0x12   : > { %s978_s7 = sshll.u32 (%p32_p4), %s1216_s23, 3  ;;  %s1127_s8 = smul.u32 (%p32_p4), 24, %s207_s30 }
  0x13   : > { %s211_s11 = scalar_lea.vmem (%p32_p4), %s1474_s0, %s978_s7 }
  0x14   : > { %v243_v0 = vld [vmem:[%s211_s11] sm:$0xff] (%p32_p4)  ;;  %v245_v1 = vld [vmem:[%s211_s11 + $0x10] sm:$0xff] (%p32_p4)  ;;  %s209_s12 = scalar_lea.vmem (%p32_p4), [#allocation2], %s1127_s8 }
  0x15   : > { %v247_v2 = vld [vmem:[%s211_s11 + $0x20] sm:$0xff] (%p32_p4)  ;;  %244 = vst [vmem:[%s209_s12] sm:$0xff] (%p32_p4), %v243_v0  ;;  %246 = vst [vmem:[%s209_s12 + $0x8] sm:$0xff] (%p32_p4), %v245_v1 }
  0x16   : > { %248 = vst [vmem:[%s209_s12 + $0x10] sm:$0xff] (%p32_p4), %v247_v2 }
  0x18 PF: > { %p979_p7 = scmp.ge.s32.totalorder %s1216_s23, 1  ;;  %p253_p8 = scmp.lt.s32.totalorder %s1216_s23, 3 }
  0x1a   : > { %p254_p9 = pnand %p979_p7, %p253_p8 }
  0x1b   : > { %s260_s13 = sand.u32 (!%p254_p9), 1, %s1208_s21   ;;  %v1218_v3 = vmov (!%p254_p9), 0.0|0.0   ;;  %vm1219_vm0 = vmmov (!%p254_p9), 0   ;;  %v1220_v4 = vmov (!%p254_p9), 0.0   ;;  %v1221_v5 = vmov (!%p254_p9), 0   ;;  %v294_v6 = vld [vmem:[%s1477_s3] sm:$0xff] (!%p254_p9) }
  0x1c   : > { %257 = sbr.rel (%p254_p9) target bundleno = 1039 (0x40f), region = 78  ;;  %1111 = vmatprep.subr.bf16.mxu0 (!%p254_p9), %v1218_v3  ;;  %1051 = vmatprep.mubr.msk.f32.mxu0 (!%p254_p9), %vm1219_vm0, %v1220_v4  ;;  %v296_v7 = vld [vmem:[%s1477_s3 + $0x10] sm:$0xf] (!%p254_p9)  ;;  %v295_v10 = vld [vmem:[%s1477_s3 + $0x8] sm:$0xff] (!%p254_p9)  ;;  %v987_v12 = vld [vmem:[%s1477_s3 + $0x18] sm:$0xff] (!%p254_p9)  ;;  %vm322_vm1 = vcmask (!%p254_p9), 1043456  }
  0x1d   : > { %s1128_s14 = smul.u32 (!%p254_p9), 24, %s260_s13  ;;  %1158 = vset.pattern.permute.xlu0 (!%p254_p9), %v1221_v5  ;;  %1159 = vset.pattern.permute.xlu1 (!%p254_p9), %v1221_v5  ;;  %v988_v14 = vld [vmem:[%s1477_s3 + $0x20] sm:$0xff] (!%p254_p9)  ;;  %vm312_vm2 = vcmask (!%p254_p9), 162816   ;;  %v989_v16 = vld [vmem:[%s1477_s3 + $0x28] sm:$0xf] (!%p254_p9)  ;;  %v1000_v17 = vld [vmem:[%s1477_s3 + $0x30] sm:$0xff] (!%p254_p9) }
  0x1e   : > { %299 = vperm.xlu0 (!%p254_p9), %1158, %v294_v6   ;;  %1114 = vmatprep.subr.bf16.mxu1 (!%p254_p9), %v1218_v3  ;;  %v288_v15 = vld [vmem:[%s1475_s1] sm:$0xff] (!%p254_p9)  ;;  %v289_v18 = vld [vmem:[%s1475_s1 + $0x8] sm:$0xff] (!%p254_p9)  ;;  %v1001_v19 = vld [vmem:[%s1477_s3 + $0x38] sm:$0xff] (!%p254_p9)  ;;  %s1129_s7 = smul.u32 (!%p254_p9), 40, %s260_s13 }
  0x1f   : > { %s262_s19 = scalar_lea.vmem (!%p254_p9), [#allocation2], %s1128_s14  ;;  %309 = vperm.xlu1 (!%p254_p9), %1159, %v296_v7   ;;  %1066 = vmatprep.mubr.msk.f32.mxu1 (!%p254_p9), %vm1219_vm0, %v1220_v4  ;;  %v1002_v20 = vld [vmem:[%s1477_s3 + $0x40] sm:$0xf] (!%p254_p9)  ;;  %v290_v21 = vld [vmem:[%s1475_s1 + $0x10] sm:$0xf] (!%p254_p9)  ;;  %v695_v24 = vld [vmem:[%s1479_s5 + $0x8] sm:$0xff] (!%p254_p9) }
  0x20   : > { %v291_v8 = vld [vmem:[%s262_s19] sm:$0xff] (!%p254_p9)  ;;  %v292_v9 = vld [vmem:[%s262_s19 + $0x8] sm:$0xff] (!%p254_p9)  ;;  %v293_v13 = vld [vmem:[%s262_s19 + $0x10] sm:$0xf] (!%p254_p9)  ;;  %s1445_s8 = scalar_lea.vmem (!%p254_p9), [#allocation3], %s1129_s7 }
  0x21   : > { %v1112_v11 = vpack.c.bf16 (!%p254_p9), %v292_v9, %v291_v8  ;;  %v698_v22 = vld [vmem:[%s1479_s5 + $0x20] sm:$0xff] (!%p254_p9)  ;;  %v696_v25 = vld [vmem:[%s1479_s5 + $0x10] sm:$0xff] (!%p254_p9)  ;;  %v697_v26 = vld [vmem:[%s1479_s5 + $0x18] sm:$0xff] (!%p254_p9) }
  0x22   : > { %304 = vperm.xlu0 (!%p254_p9), %1158, %v295_v10   ;;  %v694_v23 = vld [vmem:[%s1479_s5] sm:$0xff] (!%p254_p9)  ;;  %v425_v56 = vld [vmem:[%s1476_s2 + $0x8] sm:$0xff] (!%p254_p9)  ;;  %v426_v57 = vld [vmem:[%s1476_s2 + $0x10] sm:$0xf] (!%p254_p9) }
  0x23   : > { %1113 = vmatpush3.bf16.msra.mxu0 %v1112_v11  ;;  %433 = vperm.xlu1 %1159, %v987_v12   ;;  %v424_v54 = vld [vmem:[%s1476_s2] sm:$0xff]  ;;  %s1016_s21 = sshll.u32 (%p1287_p5), %s974_s24, 3 }
  0x24   : > { %1049 = vmatprep.subr.mxu0 %v1220_v4  ;;  %s869_s10 = scalar_lea.vmem (%p1287_p5), %s1480_s6, %s1016_s21 }
  0x26   : > { %438 = vperm.xlu0 %1158, %v988_v14  }
  0x27   : > { %1050 = vmatpush3.msk.msra.mxu0 %vm322_vm1, %v293_v13  ;;  %443 = vperm.xlu1 %1159, %v989_v16  }
  0x28   : > { %1052 = vmatmul.mubr.msk.f32.vlgmr.msra.gmra.mrb[0].mxu0 %vm312_vm2, %v288_v15  ;;  %1117 = vmatprep.subr.bf16.mxu0 %v1218_v3 }
  0x29   : > { %1054 = vmatprep.mubr.msk.f32.mxu0 %vm1219_vm0, %v1220_v4 }
  0x2a   : > { %566 = vperm.xlu0 %1158, %v1000_v17  }
  0x2b   : > { %571 = vperm.xlu1 %1159, %v1001_v19  }
  0x2c   : > { %1055 = vmatmul.mubr.msk.f32.gmra.mrb[2].mxu0 %vm312_vm2, %v289_v18 }
  0x2d   : > { %1057 = vmatprep.mubr.msk.f32.mxu0 %vm1219_vm0, %v1220_v4 }
  0x2e   : > { %576 = vperm.xlu0 %1158, %v1002_v20  }
  0x2f   : > { %721 = vperm.xlu1 %1159, %v698_v22  }
  0x30   : > { %1058 = vmatmul.mubr.msk.f32.gmra.mrb[4].mxu0 %vm312_vm2, %v290_v21 }
  0x31   : > { %1081 = vmatprep.mubr.msk.f32.mxu0 %vm1219_vm0, %v1220_v4 }
  0x32   : > { %701 = vperm.xlu0 %1158, %v694_v23   ;;  %v997_v23 = vld [vmem:[%s1476_s2 + $0x18] sm:$0xff] }
  0x33   : > { %706 = vperm.xlu1 %1159, %v695_v24  }
  0x36   : > { %711 = vperm.xlu0 %1158, %v696_v25   ;;  %v998_v25 = vld [vmem:[%s1476_s2 + $0x20] sm:$0xff] }
  0x37   : > { %716 = vperm.xlu1 %1159, %v697_v26   ;;  %v999_v26 = vld [vmem:[%s1476_s2 + $0x28] sm:$0xf] }
  0x9d   : > { %v300_v27 = vpop.permute.xlu0 %299 }
  0x9e   : > { %v310_v38 = vpop.permute.xlu1 %309 }
  0xa1   : > { %v305_v32 = vpop.permute.xlu0 %304 }
  0xa2   : > { %v434_v58 = vpop.permute.xlu1 %433 }
  0xa5   : > { %v439_v63 = vpop.permute.xlu0 %438 }
  0xa6   : > { %v444_v7 = vpop.permute.xlu1 %443 }
  0xfb   : > { %v392_v28 = vpop.f32.mrb[0].mxu0 }
  0xfc   : > { %v393_v29 = vadd.f32 %v392_v28, %v300_v27  ;;  %v1053_v30 = vpop.f32.mrb[1].mxu0 }
  0xfe   : > { %v409_v31 = vmin.f32 %v393_v29, 0.0  ;;  %vm406_vm3 = vcmp.gt.f32.partialorder %v393_v29, 0.0 }
  0xff   : > { %v397_v33 = vpop.f32.mrb[2].mxu0 }
 0x100   : > { %v412_v34 = vmul.f32 1.442695, %v409_v31  ;;  %v398_v35 = vadd.f32 %v397_v33, %v305_v32  ;;  %v1056_v36 = vpop.f32.mrb[3].mxu0  ;;  %v572_v31 = vpop.permute.xlu1 %571 }
 0x102   : > { %1160 = vpow2.f32 %v412_v34  ;;  %v410_v37 = vmin.f32 %v398_v35, 0.0  ;;  %vm407_vm4 = vcmp.gt.f32.partialorder %v398_v35, 0.0 }
 0x103   : > { %v402_v39 = vpop.f32.mrb[4].mxu0 }
 0x104   : > { %v414_v40 = vmul.f32 1.442695, %v410_v37  ;;  %v403_v41 = vadd.f32 %v402_v39, %v310_v38  ;;  %v1059_v42 = vpop.f32.mrb[5].mxu0 }
 0x106   : > { %1162 = vpow2.f32 %v414_v40  ;;  %v411_v43 = vmin.f32 %v403_v41, 0.0  ;;  %vm408_vm5 = vcmp.gt.f32.partialorder %v403_v41, 0.0 }
 0x108   : > { %v416_v44 = vmul.f32 1.442695, %v411_v43 }
 0x10a   : > { %1164 = vpow2.f32 %v416_v44 }
 0x10c   : > { %v1161_v45 = vpop.eup %1160 }
 0x10d   : > { %v984_v46 = vadd.f32 -1.0, %v1161_v45 }
 0x10f   : > { %v421_v49 = vsel %vm406_vm3, %v393_v29, %v984_v46 }
 0x110   : > { %v1163_v47 = vpop.eup %1162 }
 0x111   : > { %v985_v48 = vadd.f32 -1.0, %v1163_v47 }
 0x113   : > { %v422_v50 = vsel %vm407_vm4, %v398_v35, %v985_v48 }
 0x114   : > { %v1165_v51 = vpop.eup %1164  ;;  %v1115_v52 = vpack.c.bf16 %v422_v50, %v421_v49 }
 0x115   : > { %v986_v53 = vadd.f32 -1.0, %v1165_v51 }
 0x116   : > { %1116 = vmatpush3.bf16.msra.mxu1 %v1115_v52 }
 0x117   : > { %1064 = vmatprep.subr.mxu1 %v1220_v4  ;;  %v423_v55 = vsel %vm408_vm5, %v403_v41, %v986_v53  ;;  %v689_v53 = vld [vmem:[%s1478_s4] sm:$0xff] }
 0x11a   : > { %1065 = vmatpush3.msk.msra.mxu1 %vm322_vm1, %v423_v55 }
 0x11b   : > { %1067 = vmatmul.mubr.msk.f32.vlgmr.msra.gmra.mrb[0].mxu1 %vm312_vm2, %v424_v54  ;;  %1123 = vmatprep.subr.bf16.mxu1 %v1218_v3  ;;  %v690_v54 = vld [vmem:[%s1478_s4 + $0x8] sm:$0xff] }
 0x11c   : > { %1069 = vmatprep.mubr.msk.f32.mxu1 %vm1219_vm0, %v1220_v4 }
 0x11f   : > { %1070 = vmatmul.mubr.msk.f32.gmra.mrb[2].mxu1 %vm312_vm2, %v425_v56  ;;  %v691_v56 = vld [vmem:[%s1478_s4 + $0x10] sm:$0xff] }
 0x120   : > { %1072 = vmatprep.mubr.msk.f32.mxu1 %vm1219_vm0, %v1220_v4 }
 0x123   : > { %1073 = vmatmul.mubr.msk.f32.gmra.mrb[4].mxu1 %vm312_vm2, %v426_v57  ;;  %v692_v57 = vld [vmem:[%s1478_s4 + $0x18] sm:$0xff] }
 0x124   : > { %1099 = vmatprep.mubr.msk.f32.mxu1 %vm1219_vm0, %v1220_v4 }
 0x1ee   : > { %v524_v59 = vpop.f32.mrb[0].mxu1 }
 0x1ef   : > { %v525_v60 = vadd.f32 %v524_v59, %v434_v58  ;;  %v1068_v61 = vpop.f32.mrb[1].mxu1  ;;  %v693_v58 = vld [vmem:[%s1478_s4 + $0x20] sm:$0xff]  ;;  %v722_v59 = vpop.permute.xlu1 %721 }
 0x1f1   : > { %v541_v62 = vmin.f32 %v525_v60, 0.0  ;;  %vm538_vm6 = vcmp.gt.f32.partialorder %v525_v60, 0.0 }
 0x1f2   : > { %v529_v0 = vpop.f32.mrb[2].mxu1 }
 0x1f3   : > { %v544_v1 = vmul.f32 1.442695, %v541_v62  ;;  %v530_v2 = vadd.f32 %v529_v0, %v439_v63  ;;  %v1071_v5 = vpop.f32.mrb[3].mxu1  ;;  %v707_v61 = vpop.permute.xlu1 %706 }
 0x1f5   : > { %1166 = vpow2.f32 %v544_v1  ;;  %v542_v6 = vmin.f32 %v530_v2, 0.0  ;;  %vm539_vm7 = vcmp.gt.f32.partialorder %v530_v2, 0.0 }
 0x1f6   : > { %v534_v8 = vpop.f32.mrb[4].mxu1 }
 0x1f7   : > { %v546_v9 = vmul.f32 1.442695, %v542_v6  ;;  %v535_v10 = vadd.f32 %v534_v8, %v444_v7  ;;  %v1074_v11 = vpop.f32.mrb[5].mxu1 }
 0x1f9   : > { %1168 = vpow2.f32 %v546_v9  ;;  %v543_v12 = vmin.f32 %v535_v10, 0.0  ;;  %vm540_vm8 = vcmp.gt.f32.partialorder %v535_v10, 0.0 }
 0x1fb   : > { %v548_v13 = vmul.f32 1.442695, %v543_v12 }
 0x1fd   : > { %1170 = vpow2.f32 %v548_v13 }
 0x1ff   : > { %v1167_v14 = vpop.eup %1166 }
 0x200   : > { %v994_v15 = vadd.f32 -1.0, %v1167_v14  ;;  %v717_v14 = vpop.permute.xlu1 %716 }
 0x202   : > { %v553_v18 = vsel %vm538_vm6, %v525_v60, %v994_v15 }
 0x203   : > { %v1169_v16 = vpop.eup %1168 }
 0x204   : > { %v995_v17 = vadd.f32 -1.0, %v1169_v16 }
 0x206   : > { %v554_v19 = vsel %vm539_vm7, %v530_v2, %v995_v17 }
 0x207   : > { %v1171_v20 = vpop.eup %1170  ;;  %v1118_v21 = vpack.c.bf16 %v554_v19, %v553_v18 }
 0x208   : > { %v996_v22 = vadd.f32 -1.0, %v1171_v20 }
 0x209   : > { %1119 = vmatpush3.bf16.msra.mxu0 %v1118_v21 }
 0x20a   : > { %1079 = vmatprep.subr.mxu0 %v1220_v4  ;;  %v555_v24 = vsel %vm540_vm8, %v535_v10, %v996_v22 }
 0x20d   : > { %1080 = vmatpush3.msk.msra.mxu0 %vm322_vm1, %v555_v24 }
 0x20e   : > { %1082 = vmatmul.mubr.msk.f32.vlgmr.msra.gmra.mrb[6].mxu0 %vm312_vm2, %v997_v23  ;;  %1120 = vmatprep.subr.bf16.mxu0 %v1218_v3  ;;  %v567_v3 = vpop.permute.xlu0 %566 }
 0x20f   : > { %1084 = vmatprep.mubr.msk.f32.mxu0 %vm1219_vm0, %v1220_v4 }
 0x212   : > { %1085 = vmatmul.mubr.msk.f32.gmra.mrb[8].mxu0 %vm312_vm2, %v998_v25  ;;  %v577_v37 = vpop.permute.xlu0 %576 }
 0x213   : > { %1087 = vmatprep.mubr.msk.f32.mxu0 %vm1219_vm0, %v1220_v4 }
 0x216   : > { %1088 = vmatmul.mubr.msk.f32.gmra.mrb[10].mxu0 %vm312_vm2, %v999_v26  ;;  %v702_v60 = vpop.permute.xlu0 %701 }
 0x217   : > { %1096 = vmatprep.mubr.msk.f32.mxu0 %vm1219_vm0, %v1220_v4 }
 0x2e1   : > { %v657_v27 = vpop.f32.mrb[6].mxu0 }
 0x2e2   : > { %v658_v28 = vadd.f32 %v657_v27, %v567_v3  ;;  %v1083_v29 = vpop.f32.mrb[7].mxu0 }
 0x2e4   : > { %v674_v30 = vmin.f32 %v658_v28, 0.0  ;;  %vm671_vm9 = vcmp.gt.f32.partialorder %v658_v28, 0.0 }
 0x2e5   : > { %v662_v32 = vpop.f32.mrb[8].mxu0 }
 0x2e6   : > { %v677_v33 = vmul.f32 1.442695, %v674_v30  ;;  %v663_v34 = vadd.f32 %v662_v32, %v572_v31  ;;  %v1086_v35 = vpop.f32.mrb[9].mxu0 }
 0x2e8   : > { %1172 = vpow2.f32 %v677_v33  ;;  %v675_v36 = vmin.f32 %v663_v34, 0.0  ;;  %vm672_vm10 = vcmp.gt.f32.partialorder %v663_v34, 0.0 }
 0x2e9   : > { %v667_v38 = vpop.f32.mrb[10].mxu0 }
 0x2ea   : > { %v679_v39 = vmul.f32 1.442695, %v675_v36  ;;  %v668_v40 = vadd.f32 %v667_v38, %v577_v37  ;;  %v1089_v41 = vpop.f32.mrb[11].mxu0 }
 0x2ec   : > { %1174 = vpow2.f32 %v679_v39  ;;  %v676_v42 = vmin.f32 %v668_v40, 0.0  ;;  %vm673_vm11 = vcmp.gt.f32.partialorder %v668_v40, 0.0 }
 0x2ee   : > { %v681_v43 = vmul.f32 1.442695, %v676_v42 }
 0x2f0   : > { %1176 = vpow2.f32 %v681_v43 }
 0x2f2   : > { %v1173_v44 = vpop.eup %1172 }
 0x2f3   : > { %v1007_v45 = vadd.f32 -1.0, %v1173_v44 }
 0x2f5   : > { %v686_v48 = vsel %vm671_vm9, %v658_v28, %v1007_v45 }
 0x2f6   : > { %v1175_v46 = vpop.eup %1174 }
 0x2f7   : > { %v1008_v47 = vadd.f32 -1.0, %v1175_v46 }
 0x2f9   : > { %v687_v49 = vsel %vm672_vm10, %v663_v34, %v1008_v47 }
 0x2fa   : > { %v1177_v50 = vpop.eup %1176  ;;  %v1121_v51 = vpack.c.bf16 %v687_v49, %v686_v48 }
 0x2fb   : > { %v1009_v52 = vadd.f32 -1.0, %v1177_v50 }
 0x2fc   : > { %1122 = vmatpush3.bf16.msra.mxu0 %v1121_v51  ;;  %1125 = vmatpush3.bf16.msra.mxu1 %v1121_v51 }
 0x2fd   : > { %1094 = vmatprep.subr.mxu0 %v1220_v4  ;;  %1124 = vmatprep.subr.mxu1 %v1220_v4  ;;  %v688_v55 = vsel %vm673_vm11, %v668_v40, %v1009_v52 }
 0x300   : > { %1095 = vmatpush3.msk.msra.mxu0 %vm322_vm1, %v688_v55  ;;  %1126 = vmatpush3.msk.msra.mxu1 %vm322_vm1, %v688_v55 }
 0x301   : > { %1097 = vmatmul.mubr.msk.f32.vlgmr.msra.gmra.mrb[12].mxu0 %vm312_vm2, %v689_v53  ;;  %1100 = vmatmul.mubr.msk.f32.vlgmr.msra.gmra.mrb[6].mxu1 %vm312_vm2, %v690_v54 }
 0x302   : > { %1102 = vmatprep.mubr.msk.f32.mxu1 %vm1219_vm0, %v1220_v4 }
 0x305   : > { %1103 = vmatmul.mubr.msk.f32.gmra.mrb[8].mxu1 %vm312_vm2, %v691_v56 }
 0x306   : > { %1105 = vmatprep.mubr.msk.f32.mxu1 %vm1219_vm0, %v1220_v4 }
 0x309   : > { %1106 = vmatmul.mubr.msk.f32.gmra.mrb[10].mxu1 %vm312_vm2, %v692_v57 }
 0x30a   : > { %1108 = vmatprep.mubr.msk.f32.mxu1 %vm1219_vm0, %v1220_v4  ;;  %v712_v4 = vpop.permute.xlu0 %711 }
 0x30d   : > { %1109 = vmatmul.mubr.msk.f32.gmra.mrb[12].mxu1 %vm312_vm2, %v693_v58 }
 0x3d4   : > { %v808_v62 = vpop.f32.mrb[12].mxu0  ;;  %v813_v63 = vpop.f32.mrb[6].mxu1 }
 0x3d5   : > { %v809_v0 = vadd.f32 %v808_v62, %v702_v60  ;;  %v814_v1 = vadd.f32 %v813_v63, %v707_v61  ;;  %v1101_v2 = vpop.f32.mrb[7].mxu1  ;;  %v1098_v5 = vpop.f32.mrb[13].mxu0 }
 0x3d7   : > { %v832_v6 = vsub.f32 0.0, %v809_v0  ;;  %v833_v7 = vsub.f32 0.0, %v814_v1 }
 0x3d8   : > { %v818_v8 = vpop.f32.mrb[8].mxu1 }
 0x3d9   : > { %v835_v9 = vmul.f32 1.442695, %v832_v6  ;;  %v837_v10 = vmul.f32 1.442695, %v833_v7  ;;  %v819_v11 = vadd.f32 %v818_v8, %v712_v4  ;;  %v1104_v12 = vpop.f32.mrb[9].mxu1 }
 0x3db   : > { %1178 = vpow2.f32 %v835_v9  ;;  %v834_v13 = vsub.f32 0.0, %v819_v11 }
 0x3dc   : > { %1180 = vpow2.f32 %v837_v10  ;;  %v823_v15 = vpop.f32.mrb[10].mxu1 }
 0x3dd   : > { %v839_v16 = vmul.f32 1.442695, %v834_v13  ;;  %v824_v17 = vadd.f32 %v823_v15, %v717_v14  ;;  %v1107_v18 = vpop.f32.mrb[11].mxu1 }
 0x3df   : > { %1182 = vpow2.f32 %v839_v16  ;;  %850 = vst [vmem:[%s1445_s8 + $0x18] sm:$0xff] %v824_v17 }
 0x3e0   : > { %v828_v19 = vpop.f32.mrb[12].mxu1 }
 0x3e1   : > { %v829_v20 = vadd.f32 %v828_v19, %v722_v59  ;;  %v1110_v21 = vpop.f32.mrb[13].mxu1 }
 0x3e3   : > { %v852_v22 = vand.u32 2147483647, %v829_v20  ;;  %v851_v36 = vmax.f32 %v829_v20, 0.0 }
 0x3e5   : > { %v1179_v23 = vpop.eup %1178  ;;  %v853_v24 = vsub.f32 0.0, %v852_v22 }
 0x3e6   : > { %v1181_v25 = vpop.eup %1180  ;;  %v841_v26 = vadd.f32 1.0, %v1179_v23  ;;  %v911_v42 = vld [vmem:[%s1445_s8 + $0x18] sm:$0xff] (%p1287_p5) }
 0x3e7   : > { %v842_v3 = vadd.f32 1.0, %v1181_v25  ;;  %v854_v27 = vmul.f32 1.442695, %v853_v24  ;;  %912 = vst [vmem:[%s869_s10 + $0x30] sm:$0xff] (%p1287_p5), %v911_v42 }
 0x3e8   : > { %1184 = vrcp.f32 %v841_v26 }
 0x3e9   : > { %v1183_v28 = vpop.eup %1182  ;;  %1186 = vrcp.f32 %v842_v3 }
 0x3ea   : > { %v843_v29 = vadd.f32 1.0, %v1183_v28  ;;  %1188 = vpow2.f32 %v854_v27 }
 0x3ec   : > { %1190 = vrcp.f32 %v843_v29 }
 0x3f2   : > { %v1185_v30 = vpop.eup %1184 }
 0x3f3   : > { %v1187_v31 = vpop.eup %1186  ;;  %847 = vst [vmem:[%s1445_s8] sm:$0xff] %v1185_v30 }
 0x3f4   : > { %v1189_v32 = vpop.eup %1188  ;;  %848 = vst [vmem:[%s1445_s8 + $0x8] sm:$0xff] %v1187_v31 }
 0x3f5   : > { %v856_v33 = vadd.f32 1.0, %v1189_v32 }
 0x3f6   : > { %v1191_v34 = vpop.eup %1190 }
 0x3f7   : > { %849 = vst [vmem:[%s1445_s8 + $0x10] sm:$0xff] %v1191_v34  ;;  %1192 = vlog2.f32 %v856_v33 }
 0x3fa   : > { %v905_v39 = vld [vmem:[%s1445_s8] sm:$0xff] (%p1287_p5) }
 0x3fb   : > { %v907_v40 = vld [vmem:[%s1445_s8 + $0x8] sm:$0xff] (%p1287_p5)  ;;  %906 = vst [vmem:[%s869_s10] sm:$0xff] (%p1287_p5), %v905_v39 }
 0x3fc   : > { %908 = vst [vmem:[%s869_s10 + $0x10] sm:$0xff] (%p1287_p5), %v907_v40 }
 0x3fe   : > { %v909_v41 = vld [vmem:[%s1445_s8 + $0x10] sm:$0xff] (%p1287_p5) }
 0x3ff   : > { %910 = vst [vmem:[%s869_s10 + $0x20] sm:$0xff] (%p1287_p5), %v909_v41 }
 0x400   : > { %867 = sbr.rel (!%p1287_p5) target bundleno = 1039 (0x40f), region = 86 }
 0x401   : > { %v1193_v35 = vpop.eup %1192 }
 0x402   : > { %v858_v37 = vmul.f32 0.6931472, %v1193_v35 }
 0x404   : > { %v859_v38 = vadd.f32 %v858_v37, %v851_v36 }
 0x406   : > { %860 = vst [vmem:[%s1445_s8 + $0x20] sm:$0xff] %v859_v38 }
 0x40d   : > { %v913_v43 = vld [vmem:[%s1445_s8 + $0x20] sm:$0xff] }
 0x40e   : > { %914 = vst [vmem:[%s869_s10 + $0x40] sm:$0xff] %v913_v43 }
 0x40f PF: > { %p13_p10 = scmp.ge.s32.totalorder %s1274_s25, 4   ;;  %s1482_s21 = smov %s1212_s22 }
 0x410   : > { %s1483_s22 = smov %s1285_s28  ;;  %s1484_s23 = smov %s1274_s25 }
 0x411   :  { %15 = sbr.rel (!%p13_p10) target bundleno = 2 (0x2), region = 158 }

</bundles_post_ra>
